<compile_context>
chip_gen: v5e
topology: v5e:2x2
jax: 0.10.0
libtpu: 0.0.40
codegen_flags: <defaults>
</compile_context>

<pallas_src>
import functools

import jax
import jax.numpy as jnp
from jax import lax
from jax.experimental import pallas as pl
from jax.experimental.pallas import tpu as pltpu

KSIZE = 7
PAD = 3


# --------------------------------------------------------------------------- #
# Helpers
# --------------------------------------------------------------------------- #
def _roll_flat(x, shift):
    """out[..., i] = x[..., (i + shift) mod n]  (static shift, XLU rotate)."""
    n = x.shape[-1]
    s = (-shift) % n
    if s == 0:
        return x
    return pltpu.roll(x, s, axis=x.ndim - 1)


def _conv_band_matrix(conv_weight, H, W):
    """Dense banded matrix of the 7x7 conv (zero padding baked in).

    Returns (2*HW, HW) f32 with  out[d] = sum_s feats[s] * M[s, d],
    feats = concat(avg_flat, max_flat).
    """
    HW = H * W
    idx = jnp.arange(HW)
    r = idx // W
    c = idx % W
    dy = r[:, None] - r[None, :]          # (src, dst) row offset
    dx = c[:, None] - c[None, :]          # (src, dst) col offset
    valid = (jnp.abs(dy) <= PAD) & (jnp.abs(dx) <= PAD)
    ky = jnp.clip(dy + PAD, 0, KSIZE - 1)
    kx = jnp.clip(dx + PAD, 0, KSIZE - 1)
    w = conv_weight.astype(jnp.float32)[0]        # (2, 7, 7)
    mats = []
    for ci in range(2):
        tap = w[ci][ky, kx]                       # (HW, HW) gather
        mats.append(jnp.where(valid, tap, 0.0))
    return jnp.concatenate(mats, axis=0)          # (2*HW, HW)


def _pick_b_tile(N, C, HW, itemsize):
    """Sublane-aligned batch block size, VMEM-capped (v7x: 64 MiB per TC)."""
    sub = 8 if itemsize >= 4 else 16
    target = 32 if itemsize >= 4 else 64
    # Keep the double-buffered input block well inside VMEM on every chip.
    vmem_rows = max(sub, (8 * 1024 * 1024) // max(1, C * HW * itemsize))
    bt = min(target, vmem_rows)
    bt = max(sub, (bt // sub) * sub)
    n_round = ((N + sub - 1) // sub) * sub
    return min(bt, n_round)


# --------------------------------------------------------------------------- #
# Kernels
# --------------------------------------------------------------------------- #
def _channel_mean_max(x_ref, C):
    """Slice-wise channel reduction: reads x_ref[:, c, :] one slice at a time."""
    s = x_ref[:, 0, :].astype(jnp.float32)
    m = s
    for c in range(1, C):
        xc = x_ref[:, c, :].astype(jnp.float32)
        s = s + xc
        m = jnp.maximum(m, xc)
    return s * (1.0 / C), m


def _sa_mxu_kernel(x_ref, w_ref, o_ref, *, C):
    # x_ref: (B, C, HW) VMEM   w_ref: (2*HW, HW) VMEM   o_ref: (B, HW) VMEM
    HW = o_ref.shape[1]
    avg, mx = _channel_mean_max(x_ref, C)
    # 7x7 conv (zero padding baked into the band matrix) as two MXU matmuls.
    y = jnp.dot(avg, w_ref[0:HW, :], preferred_element_type=jnp.float32)
    y = y + jnp.dot(mx, w_ref[HW:2 * HW, :], preferred_element_type=jnp.float32)
    o_ref[...] = jax.nn.sigmoid(y).astype(o_ref.dtype)


def _sa_roll_kernel(x_ref, w_ref, o_ref, *, H, W, C, chunk):
    # x_ref: (B, C, HW) VMEM   w_ref: (2*49,) SMEM (order [c, ky, kx])
    # o_ref: (B, HW) VMEM.  B is a multiple of `chunk` (sublane size).
    B = x_ref.shape[0]
    HW = H * W

    avg, mx = _channel_mean_max(x_ref, C)

    # Coordinate planes + hoisted edge predicates (shared across chunks/planes).
    flat = lax.broadcasted_iota(jnp.int32, (chunk, HW), 1)
    col = flat % W
    row = flat // W
    col_ok, row_ok = {}, {}
    for d in range(1, PAD + 1):
        col_ok[d] = col < (W - d)
        col_ok[-d] = col >= d
        row_ok[d] = row < (H - d)
        row_ok[-d] = row >= d

    for ch in range(B // chunk):
        lo = ch * chunk
        planes = (avg[lo:lo + chunk, :], mx[lo:lo + chunk, :])
        accs = [jnp.zeros((chunk, HW), jnp.float32),
                jnp.zeros((chunk, HW), jnp.float32)]
        for ci, plane in enumerate(planes):
            # 7 column-shifted, horizontally edge-masked copies (built once,
            # reused by all 7 kernel rows).  A flat-axis roll by dx is exact
            # for in-row reads; any row-crossing read is exactly the x-out-of-
            # range case, zeroed by the column mask (== conv zero padding).
            col_shifted = []
            for kx in range(KSIZE):
                dx = kx - PAD
                sh = _roll_flat(plane, dx)
                if dx != 0:
                    sh = jnp.where(col_ok[dx], sh, 0.0)
                col_shifted.append(sh)
            for ky in range(KSIZE):
                dy = ky - PAD
                base = ci * KSIZE * KSIZE + ky * KSIZE
                # 2-way tree reduce of the 7 horizontal taps (shorter dep chain).
                terms = [w_ref[base + kx] * col_shifted[kx] for kx in range(KSIZE)]
                while len(terms) > 1:
                    nxt = [terms[i] + terms[i + 1]
                           for i in range(0, len(terms) - 1, 2)]
                    if len(terms) % 2:
                        nxt.append(terms[-1])
                    terms = nxt
                # Vertical shift by dy rows == roll by dy*W, then zero rows
                # where y+dy falls outside [0, H).
                sh = _roll_flat(terms[0], dy * W)
                if dy != 0:
                    sh = jnp.where(row_ok[dy], sh, 0.0)
                accs[ci] = accs[ci] + sh
        o_ref[lo:lo + chunk, :] = jax.nn.sigmoid(accs[0] + accs[1]).astype(o_ref.dtype)


# --------------------------------------------------------------------------- #
# Wrapper
# --------------------------------------------------------------------------- #
def spatial_attention(x, conv_weight, *, b_tile=None, use_mxu=None):
    """x: (N, C, H, W); conv_weight: (1, 2, 7, 7). Returns (N, 1, H, W)."""
    N, C, H, W = x.shape
    HW = H * W
    itemsize = jnp.dtype(x.dtype).itemsize

    if use_mxu is None:
        use_mxu = HW <= 1024          # band matrix grows as HW^2; keep <= 8 MiB

    if b_tile is None:
        b_tile = _pick_b_tile(N, C, HW, itemsize)

    # Pad the batch up to a multiple of b_tile (never degrade to b_tile=1).
    n_pad = ((N + b_tile - 1) // b_tile) * b_tile
    if n_pad != N:
        x = jnp.pad(x, ((0, n_pad - N), (0, 0), (0, 0), (0, 0)))
    grid = (n_pad // b_tile,)

    x_flat = x.reshape(n_pad, C, HW)                 # lane-dense spatial axis

    if use_mxu:
        w_arg = _conv_band_matrix(conv_weight, H, W)              # (2*HW, HW)
        w_spec = pl.BlockSpec((2 * HW, HW), lambda b: (0, 0))
        kernel = functools.partial(_sa_mxu_kernel, C=C)
        w_block_bytes = 2 * HW * HW * 4
    else:
        w_arg = conv_weight.reshape(-1).astype(jnp.float32)       # (2*49,)
        w_spec = pl.BlockSpec(memory_space=pltpu.MemorySpace.SMEM)
        chunk = 8 if itemsize >= 4 else 16
        kernel = functools.partial(_sa_roll_kernel, H=H, W=W, C=C, chunk=chunk)
        w_block_bytes = 0

    blk_in = b_tile * C * HW * itemsize
    blk_out = b_tile * HW * itemsize
    vmem_limit = min(128 * 1024 * 1024,
                     2 * (blk_in + blk_out) + 2 * w_block_bytes + (8 << 20))

    out_flat = pl.pallas_call(
        kernel,
        out_shape=jax.ShapeDtypeStruct((n_pad, HW), x.dtype),
        grid_spec=pltpu.PrefetchScalarGridSpec(
            num_scalar_prefetch=0,
            grid=grid,
            in_specs=[
                pl.BlockSpec((b_tile, C, HW), lambda b: (b, 0, 0)),
                w_spec,
            ],
            out_specs=pl.BlockSpec((b_tile, HW), lambda b: (b, 0)),
        ),
        compiler_params=pltpu.CompilerParams(
            dimension_semantics=("parallel",),
            vmem_limit_bytes=int(vmem_limit),
        ),
    )(x_flat, w_arg)

    return out_flat[:N].reshape(N, 1, H, W)


def spatial_attention_reference(x, conv_weight):
    """Pure-JAX reference matching the PyTorch forward pass."""
    avg_out = jnp.mean(x, axis=1, keepdims=True)
    max_out = jnp.max(x, axis=1, keepdims=True)
    cat = jnp.concatenate([avg_out, max_out], axis=1)
    y = lax.conv_general_dilated(
        cat, conv_weight,
        window_strides=(1, 1),
        padding=[(PAD, PAD), (PAD, PAD)],
        dimension_numbers=("NCHW", "OIHW", "NCHW"),
        precision=lax.Precision.HIGHEST,
    )
    return jax.nn.sigmoid(y)


if __name__ == "__main__":
    key = jax.random.PRNGKey(0)
    kx_key, kw_key = jax.random.split(key)

    N, C, H, W = 2, 4, 16, 16
    x = jax.random.normal(kx_key, (N, C, H, W), dtype=jnp.float32)

    # Same shape as torch.nn.Conv2d(2, 1, 7, bias=False).weight
    conv_weight = (
        jax.random.normal(kw_key, (1, 2, KSIZE, KSIZE), dtype=jnp.float32) * 0.1
    )

    ref = spatial_attention_reference(x, conv_weight)

    # MXU (banded-matmul) path — the default for small spatial planes.
    out_mxu = jax.block_until_ready(spatial_attention(x, conv_weight))
    assert out_mxu.shape == (N, 1, H, W), out_mxu.shape
    assert jnp.allclose(out_mxu, ref, atol=2e-3, rtol=2e-3), (
        float(jnp.max(jnp.abs(out_mxu - ref)))
    )

    # Roll/VPU path — used for large spatial planes; validate it too.
    out_vpu = jax.block_until_ready(
        spatial_attention(x, conv_weight, use_mxu=False)
    )
    assert out_vpu.shape == (N, 1, H, W), out_vpu.shape
    assert jnp.allclose(out_vpu, ref, atol=1e-5, rtol=1e-5), (
        float(jnp.max(jnp.abs(out_vpu - ref)))
    )

    print("KERNEL_OK")
</pallas_src>

<mosaic_0001>
module attributes {stable_mosaic.version = 11 : i64} {
  func.func @_sa_mxu_kernel(%arg0: i32, %arg1: memref<8x4x256xf32, #tpu.memory_space<vmem>>, %arg2: memref<512x256xf32, #tpu.memory_space<vmem>>, %arg3: memref<8x256xf32, #tpu.memory_space<vmem>>) attributes {dimension_semantics = [#tpu.dimension_semantics<parallel>], iteration_bounds = array<i64: 1>, scalar_prefetch = 0 : i64, scratch_operands = 0 : i64, tpu.core_type = #tpu.core_type<tc>, window_params = [{transform_indices = @transform_0, window_bounds = array<i64: 8, 4, 256>}, {pipeline_mode = #tpu.pipeline_mode<synchronous>, transform_indices = @transform_1, window_bounds = array<i64: 512, 256>}, {transform_indices = @transform_2, window_bounds = array<i64: 8, 256>}]} {
    %c0 = arith.constant 0 : index
    %c0_0 = arith.constant 0 : index
    %c0_1 = arith.constant 0 : index
    %0 = vector.load %arg1[%c0, %c0_0, %c0_1] : memref<8x4x256xf32, #tpu.memory_space<vmem>>, vector<8x1x256xf32>
    %1 = vector.shape_cast %0 : vector<8x1x256xf32> to vector<8x256xf32>
    %c0_2 = arith.constant 0 : index
    %c1 = arith.constant 1 : index
    %c0_3 = arith.constant 0 : index
    %2 = vector.load %arg1[%c0_2, %c1, %c0_3] : memref<8x4x256xf32, #tpu.memory_space<vmem>>, vector<8x1x256xf32>
    %3 = vector.shape_cast %2 : vector<8x1x256xf32> to vector<8x256xf32>
    %4 = arith.addf %1, %3 : vector<8x256xf32>
    %5 = arith.maximumf %1, %3 : vector<8x256xf32>
    %c0_4 = arith.constant 0 : index
    %c2 = arith.constant 2 : index
    %c0_5 = arith.constant 0 : index
    %6 = vector.load %arg1[%c0_4, %c2, %c0_5] : memref<8x4x256xf32, #tpu.memory_space<vmem>>, vector<8x1x256xf32>
    %7 = vector.shape_cast %6 : vector<8x1x256xf32> to vector<8x256xf32>
    %8 = arith.addf %4, %7 : vector<8x256xf32>
    %9 = arith.maximumf %5, %7 : vector<8x256xf32>
    %c0_6 = arith.constant 0 : index
    %c3 = arith.constant 3 : index
    %c0_7 = arith.constant 0 : index
    %10 = vector.load %arg1[%c0_6, %c3, %c0_7] : memref<8x4x256xf32, #tpu.memory_space<vmem>>, vector<8x1x256xf32>
    %11 = vector.shape_cast %10 : vector<8x1x256xf32> to vector<8x256xf32>
    %12 = arith.addf %8, %11 : vector<8x256xf32>
    %13 = arith.maximumf %9, %11 : vector<8x256xf32>
    %cst = arith.constant 2.500000e-01 : f32
    %14 = vector.broadcast %cst : f32 to vector<8x256xf32>
    %15 = arith.mulf %12, %14 : vector<8x256xf32>
    %c0_8 = arith.constant 0 : index
    %c0_9 = arith.constant 0 : index
    %16 = vector.load %arg2[%c0_8, %c0_9] : memref<512x256xf32, #tpu.memory_space<vmem>>, vector<256x256xf32>
    %cst_10 = arith.constant dense<0.000000e+00> : vector<8x256xf32>
    %17 = tpu.matmul %15, %16, %cst_10 {dimension_numbers = #tpu.dot_dimension_numbers<[1], [0], [0], [1], [0, 0, 1, 1], [], []>} : vector<8x256xf32>, vector<256x256xf32>, vector<8x256xf32> -> vector<8x256xf32>
    %c256 = arith.constant 256 : index
    %c0_11 = arith.constant 0 : index
    %18 = vector.load %arg2[%c256, %c0_11] : memref<512x256xf32, #tpu.memory_space<vmem>>, vector<256x256xf32>
    %cst_12 = arith.constant dense<0.000000e+00> : vector<8x256xf32>
    %19 = tpu.matmul %13, %18, %cst_12 {dimension_numbers = #tpu.dot_dimension_numbers<[1], [0], [0], [1], [0, 0, 1, 1], [], []>} : vector<8x256xf32>, vector<256x256xf32>, vector<8x256xf32> -> vector<8x256xf32>
    %20 = arith.addf %17, %19 : vector<8x256xf32>
    %21 = arith.negf %20 : vector<8x256xf32>
    %22 = math.exp %21 : vector<8x256xf32>
    %cst_13 = arith.constant 1.000000e+00 : f32
    %23 = vector.broadcast %cst_13 : f32 to vector<8x256xf32>
    %24 = arith.addf %23, %22 : vector<8x256xf32>
    %25 = arith.divf %23, %24 : vector<8x256xf32>
    %c0_14 = arith.constant 0 : index
    %c0_15 = arith.constant 0 : index
    %26 = vector.load %arg3[%c0_14, %c0_15] : memref<8x256xf32, #tpu.memory_space<vmem>>, vector<8x256xf32>
    tpu.vector_store %arg3[%c0_14, %c0_15], %25 {strides = array<i32>} : memref<8x256xf32, #tpu.memory_space<vmem>>, vector<8x256xf32>,
    return
  }
  func.func @transform_0(%arg0: i32) -> (i32, i32, i32) {
    %c0_i32 = arith.constant 0 : i32
    %c0_i32_0 = arith.constant 0 : i32
    %c0_i32_1 = arith.constant 0 : i32
    return %arg0, %c0_i32, %c0_i32_0 : i32, i32, i32
  }
  func.func @transform_1(%arg0: i32) -> (i32, i32) {
    %c0_i32 = arith.constant 0 : i32
    %c0_i32_0 = arith.constant 0 : i32
    %c0_i32_1 = arith.constant 0 : i32
    return %c0_i32, %c0_i32_0 : i32, i32
  }
  func.func @transform_2(%arg0: i32) -> (i32, i32) {
    %c0_i32 = arith.constant 0 : i32
    %c0_i32_0 = arith.constant 0 : i32
    return %arg0, %c0_i32 : i32, i32
  }
}

</mosaic_0001>

<bundles_post_ra>
// kernel: tpu_custom_call.1
= control target key start
LH: loop header
LB: loop body
LE: loop exit
PB: predicated region body
PF: predicated region fallthrough
CT: control target
= control target key end

     0   :  { %7 = vsyncpa [#allocation3], 0  ;;  %s817_s0 = inlined_call_operand.hbm [shape: f32[8,4,256], index: 0, kind: input, shape index: {}]   ;;  %s818_s1 = inlined_call_operand.hbm [shape: f32[512,256], index: 1, kind: input, shape index: {}]   ;;  %s819_s2 = inlined_call_operand.hbm [shape: f32[8,256], index: 2, kind: output, shape index: {}]  }
   0x1   :  { %8 = vsyncpa [#allocation6], 0 }
   0x2   :  { %9 = vsyncpa [#allocation4], 0  ;;  %s14_s11 = sshll.u32 %s817_s0, 4  ;;  %s658_s12 = smov [#allocation2]   ;;  %s15_s11 = int_to_ptr.hbm [resolvable:$true] %s14_s11 }
   0x3   :  { %s16_s13 = sshll.u32 %s658_s12, 4  ;;  %s27_s16 = sshll.u32 %s818_s1, 4  ;;  %s17_s13 = int_to_ptr.vmem [resolvable:$true] %s16_s13  ;;  %s28_s16 = int_to_ptr.hbm [resolvable:$true] %s27_s16 }
   0x4   :  { %s659_s17 = smov 128   ;;  %s660_s18 = smov 8  }
   0x5   :  { %22 = dma.hbm_to_vmem [thread:$0]  %s15_s11, 1024, %s17_s13, [#allocation3], %s659_s17, %s659_s17, %s660_s18  }
   0x6   :  { %s661_s19 = smov [#allocation5]   ;;  %s662_s21 = smov 256  }
   0x7   :  { %s29_s20 = sshll.u32 %s661_s19, 4  ;;  %s663_s22 = smov 16   ;;  %s30_s20 = int_to_ptr.vmem [resolvable:$true] %s29_s20 }
   0x8   :  { %35 = dma.hbm_to_vmem [thread:$0]  %s28_s16, 16384, %s30_s20, [#allocation6], %s662_s21, %s662_s21, %s663_s22  }
   0x9   :  { %652 = dma.done.wait [#allocation3], 1024  }
   0xa   :  { %653 = vsyncadd [#allocation3], 4294966272 }
   0xb   :  { %654 = dma.done.wait [#allocation6], 16384  }
   0xc   :  { %655 = vsyncadd [#allocation6], 4294950912  ;;  %v257_v0 = vld [vmem:[#allocation5 + $0x2f0] sm:$0xff]  ;;  %v258_v1 = vld [vmem:[#allocation5 + $0x2f8] sm:$0xff]  ;;  %s664_s0 = smov [#allocation7]   ;;  %s552_s25 = sshll.u32 %s819_s2, 4  ;;  %s553_s25 = int_to_ptr.hbm [resolvable:$true] %s552_s25 }
   0xd   :  { %v255_v2 = vld [vmem:[#allocation5 + $0x2e0] sm:$0xff]  ;;  %318 = vmatpush.msra.mxu0 %v257_v0  ;;  %358 = vmatpush.msra.mxu2 %v258_v1  ;;  %v289_v3 = vld [vmem:[#allocation5 + $0x3f0] sm:$0xff]  ;;  %v256_v4 = vld [vmem:[#allocation5 + $0x2e8] sm:$0xff]  ;;  %s550_s1 = sshll.u32 %s664_s0, 4  ;;  %s551_s1 = int_to_ptr.vmem [resolvable:$true] %s550_s1 }
   0xe   :  { %v290_v5 = vld [vmem:[#allocation5 + $0x3f8] sm:$0xff]  ;;  %338 = vmatpush.msra.mxu1 %v289_v3  ;;  %v253_v6 = vld [vmem:[#allocation5 + $0x2d0] sm:$0xff]  ;;  %v287_v7 = vld [vmem:[#allocation5 + $0x3e0] sm:$0xff] }
   0xf   :  { %378 = vmatpush.msra.mxu3 %v290_v5  ;;  %v254_v8 = vld [vmem:[#allocation5 + $0x2d8] sm:$0xff]  ;;  %319 = vmatpush.msra.mxu0 %v255_v2  ;;  %v288_v9 = vld [vmem:[#allocation5 + $0x3e8] sm:$0xff]  ;;  %v285_v10 = vld [vmem:[#allocation5 + $0x3d0] sm:$0xff] }
  0x10   :  { %359 = vmatpush.msra.mxu2 %v256_v4  ;;  %339 = vmatpush.msra.mxu1 %v287_v7  ;;  %v251_v11 = vld [vmem:[#allocation5 + $0x2c0] sm:$0xff]  ;;  %v252_v12 = vld [vmem:[#allocation5 + $0x2c8] sm:$0xff]  ;;  %v286_v13 = vld [vmem:[#allocation5 + $0x3d8] sm:$0xff] }
  0x11   :  { %379 = vmatpush.msra.mxu3 %v288_v9  ;;  %320 = vmatpush.msra.mxu0 %v253_v6  ;;  %v283_v14 = vld [vmem:[#allocation5 + $0x3c0] sm:$0xff]  ;;  %v284_v15 = vld [vmem:[#allocation5 + $0x3c8] sm:$0xff]  ;;  %v249_v16 = vld [vmem:[#allocation5 + $0x2b0] sm:$0xff] }
  0x12   :  { %360 = vmatpush.msra.mxu2 %v254_v8  ;;  %340 = vmatpush.msra.mxu1 %v285_v10  ;;  %v250_v17 = vld [vmem:[#allocation5 + $0x2b8] sm:$0xff]  ;;  %v281_v18 = vld [vmem:[#allocation5 + $0x3b0] sm:$0xff]  ;;  %v247_v20 = vld [vmem:[#allocation5 + $0x2a0] sm:$0xff] }
  0x13   :  { %380 = vmatpush.msra.mxu3 %v286_v13  ;;  %321 = vmatpush.msra.mxu0 %v251_v11  ;;  %v282_v19 = vld [vmem:[#allocation5 + $0x3b8] sm:$0xff]  ;;  %v248_v21 = vld [vmem:[#allocation5 + $0x2a8] sm:$0xff]  ;;  %v279_v22 = vld [vmem:[#allocation5 + $0x3a0] sm:$0xff] }
  0x14   :  { %361 = vmatpush.msra.mxu2 %v252_v12  ;;  %341 = vmatpush.msra.mxu1 %v283_v14  ;;  %v280_v23 = vld [vmem:[#allocation5 + $0x3a8] sm:$0xff]  ;;  %v245_v24 = vld [vmem:[#allocation5 + $0x290] sm:$0xff]  ;;  %v246_v25 = vld [vmem:[#allocation5 + $0x298] sm:$0xff] }
  0x15   :  { %381 = vmatpush.msra.mxu3 %v284_v15  ;;  %322 = vmatpush.msra.mxu0 %v249_v16  ;;  %v277_v26 = vld [vmem:[#allocation5 + $0x390] sm:$0xff]  ;;  %v278_v27 = vld [vmem:[#allocation5 + $0x398] sm:$0xff]  ;;  %v243_v28 = vld [vmem:[#allocation5 + $0x280] sm:$0xff] }
  0x16   :  { %362 = vmatpush.msra.mxu2 %v250_v17  ;;  %342 = vmatpush.msra.mxu1 %v281_v18  ;;  %v244_v29 = vld [vmem:[#allocation5 + $0x288] sm:$0xff]  ;;  %v275_v30 = vld [vmem:[#allocation5 + $0x380] sm:$0xff]  ;;  %v241_v32 = vld [vmem:[#allocation5 + $0x270] sm:$0xff] }
  0x17   :  { %382 = vmatpush.msra.mxu3 %v282_v19  ;;  %323 = vmatpush.msra.mxu0 %v247_v20  ;;  %v276_v31 = vld [vmem:[#allocation5 + $0x388] sm:$0xff]  ;;  %v242_v33 = vld [vmem:[#allocation5 + $0x278] sm:$0xff]  ;;  %v273_v34 = vld [vmem:[#allocation5 + $0x370] sm:$0xff] }
  0x18   :  { %363 = vmatpush.msra.mxu2 %v248_v21  ;;  %343 = vmatpush.msra.mxu1 %v279_v22  ;;  %v274_v35 = vld [vmem:[#allocation5 + $0x378] sm:$0xff]  ;;  %v239_v36 = vld [vmem:[#allocation5 + $0x260] sm:$0xff]  ;;  %v240_v37 = vld [vmem:[#allocation5 + $0x268] sm:$0xff] }
  0x19   :  { %383 = vmatpush.msra.mxu3 %v280_v23  ;;  %324 = vmatpush.msra.mxu0 %v245_v24  ;;  %v271_v38 = vld [vmem:[#allocation5 + $0x360] sm:$0xff]  ;;  %v272_v39 = vld [vmem:[#allocation5 + $0x368] sm:$0xff]  ;;  %v237_v40 = vld [vmem:[#allocation5 + $0x250] sm:$0xff] }
  0x1a   :  { %364 = vmatpush.msra.mxu2 %v246_v25  ;;  %344 = vmatpush.msra.mxu1 %v277_v26  ;;  %v238_v41 = vld [vmem:[#allocation5 + $0x258] sm:$0xff]  ;;  %v269_v42 = vld [vmem:[#allocation5 + $0x350] sm:$0xff]  ;;  %v235_v44 = vld [vmem:[#allocation5 + $0x240] sm:$0xff] }
  0x1b   :  { %384 = vmatpush.msra.mxu3 %v278_v27  ;;  %325 = vmatpush.msra.mxu0 %v243_v28  ;;  %v270_v43 = vld [vmem:[#allocation5 + $0x358] sm:$0xff]  ;;  %v236_v45 = vld [vmem:[#allocation5 + $0x248] sm:$0xff]  ;;  %v267_v46 = vld [vmem:[#allocation5 + $0x340] sm:$0xff] }
  0x1c   :  { %365 = vmatpush.msra.mxu2 %v244_v29  ;;  %345 = vmatpush.msra.mxu1 %v275_v30  ;;  %v268_v47 = vld [vmem:[#allocation5 + $0x348] sm:$0xff]  ;;  %v233_v48 = vld [vmem:[#allocation5 + $0x230] sm:$0xff]  ;;  %v234_v49 = vld [vmem:[#allocation5 + $0x238] sm:$0xff] }
  0x1d   :  { %385 = vmatpush.msra.mxu3 %v276_v31  ;;  %326 = vmatpush.msra.mxu0 %v241_v32  ;;  %v265_v50 = vld [vmem:[#allocation5 + $0x330] sm:$0xff]  ;;  %v266_v51 = vld [vmem:[#allocation5 + $0x338] sm:$0xff]  ;;  %v231_v52 = vld [vmem:[#allocation5 + $0x220] sm:$0xff] }
  0x1e   :  { %366 = vmatpush.msra.mxu2 %v242_v33  ;;  %346 = vmatpush.msra.mxu1 %v273_v34  ;;  %v232_v53 = vld [vmem:[#allocation5 + $0x228] sm:$0xff]  ;;  %v263_v54 = vld [vmem:[#allocation5 + $0x320] sm:$0xff]  ;;  %v229_v56 = vld [vmem:[#allocation5 + $0x210] sm:$0xff] }
  0x1f   :  { %386 = vmatpush.msra.mxu3 %v274_v35  ;;  %327 = vmatpush.msra.mxu0 %v239_v36  ;;  %v264_v55 = vld [vmem:[#allocation5 + $0x328] sm:$0xff]  ;;  %v230_v57 = vld [vmem:[#allocation5 + $0x218] sm:$0xff]  ;;  %v261_v58 = vld [vmem:[#allocation5 + $0x310] sm:$0xff] }
  0x20   :  { %367 = vmatpush.msra.mxu2 %v240_v37  ;;  %347 = vmatpush.msra.mxu1 %v271_v38  ;;  %v262_v59 = vld [vmem:[#allocation5 + $0x318] sm:$0xff]  ;;  %v227_v60 = vld [vmem:[#allocation5 + $0x200] sm:$0xff]  ;;  %v228_v61 = vld [vmem:[#allocation5 + $0x208] sm:$0xff] }
  0x21   :  { %387 = vmatpush.msra.mxu3 %v272_v39  ;;  %328 = vmatpush.msra.mxu0 %v237_v40  ;;  %v193_v62 = vld [vmem:[#allocation5 + $0xf0] sm:$0xff]  ;;  %v194_v63 = vld [vmem:[#allocation5 + $0xf8] sm:$0xff]  ;;  %v259_v0 = vld [vmem:[#allocation5 + $0x300] sm:$0xff] }
  0x22   :  { %368 = vmatpush.msra.mxu2 %v238_v41  ;;  %348 = vmatpush.msra.mxu1 %v269_v42  ;;  %v260_v1 = vld [vmem:[#allocation5 + $0x308] sm:$0xff]  ;;  %v191_v2 = vld [vmem:[#allocation5 + $0xe0] sm:$0xff]  ;;  %v225_v3 = vld [vmem:[#allocation5 + $0x1f0] sm:$0xff] }
  0x23   :  { %388 = vmatpush.msra.mxu3 %v270_v43  ;;  %329 = vmatpush.msra.mxu0 %v235_v44  ;;  %v192_v4 = vld [vmem:[#allocation5 + $0xe8] sm:$0xff]  ;;  %v226_v5 = vld [vmem:[#allocation5 + $0x1f8] sm:$0xff]  ;;  %v189_v6 = vld [vmem:[#allocation5 + $0xd0] sm:$0xff] }
  0x24   :  { %369 = vmatpush.msra.mxu2 %v236_v45  ;;  %349 = vmatpush.msra.mxu1 %v267_v46  ;;  %v223_v7 = vld [vmem:[#allocation5 + $0x1e0] sm:$0xff]  ;;  %v190_v8 = vld [vmem:[#allocation5 + $0xd8] sm:$0xff]  ;;  %v224_v9 = vld [vmem:[#allocation5 + $0x1e8] sm:$0xff] }
  0x25   :  { %389 = vmatpush.msra.mxu3 %v268_v47  ;;  %330 = vmatpush.msra.mxu0 %v233_v48  ;;  %v187_v10 = vld [vmem:[#allocation5 + $0xc0] sm:$0xff]  ;;  %v221_v11 = vld [vmem:[#allocation5 + $0x1d0] sm:$0xff]  ;;  %v188_v12 = vld [vmem:[#allocation5 + $0xc8] sm:$0xff] }
  0x26   :  { %370 = vmatpush.msra.mxu2 %v234_v49  ;;  %350 = vmatpush.msra.mxu1 %v265_v50  ;;  %v222_v13 = vld [vmem:[#allocation5 + $0x1d8] sm:$0xff]  ;;  %v185_v14 = vld [vmem:[#allocation5 + $0xb0] sm:$0xff]  ;;  %v219_v15 = vld [vmem:[#allocation5 + $0x1c0] sm:$0xff] }
  0x27   :  { %390 = vmatpush.msra.mxu3 %v266_v51  ;;  %331 = vmatpush.msra.mxu0 %v231_v52  ;;  %v186_v16 = vld [vmem:[#allocation5 + $0xb8] sm:$0xff]  ;;  %v220_v17 = vld [vmem:[#allocation5 + $0x1c8] sm:$0xff]  ;;  %v183_v18 = vld [vmem:[#allocation5 + $0xa0] sm:$0xff] }
  0x28   :  { %371 = vmatpush.msra.mxu2 %v232_v53  ;;  %351 = vmatpush.msra.mxu1 %v263_v54  ;;  %v217_v19 = vld [vmem:[#allocation5 + $0x1b0] sm:$0xff]  ;;  %v686_v20 = vld [vmem:[#allocation2] ss:$4 sm:$0x3]  ;;  %v184_v21 = vld [vmem:[#allocation5 + $0xa8] sm:$0xff] }
  0x29   :  { %391 = vmatpush.msra.mxu3 %v264_v55  ;;  %332 = vmatpush.msra.mxu0 %v229_v56  ;;  %v218_v22 = vld [vmem:[#allocation5 + $0x1b8] sm:$0xff]  ;;  %v688_v23 = vld [vmem:[#allocation2 + $0x8] ss:$4 sm:$0x3]  ;;  %v181_v25 = vld [vmem:[#allocation5 + $0x90] sm:$0xff] }
  0x2a   :  { %372 = vmatpush.msra.mxu2 %v230_v57  ;;  %352 = vmatpush.msra.mxu1 %v261_v58  ;;  %v690_v24 = vld [vmem:[#allocation2 + $0x10] ss:$4 sm:$0x3]  ;;  %v215_v26 = vld [vmem:[#allocation5 + $0x1a0] sm:$0xff]  ;;  %v182_v29 = vld [vmem:[#allocation5 + $0x98] sm:$0xff] }
  0x2b   :  { %392 = vmatpush.msra.mxu3 %v262_v59  ;;  %333 = vmatpush.msra.mxu0 %v227_v60  ;;  %v692_v27 = vld [vmem:[#allocation2 + $0x18] ss:$4 sm:$0x3]  ;;  %v694_v28 = vld [vmem:[#allocation2 + $0x20] ss:$4 sm:$0x3] }
  0x2c   :  { %373 = vmatpush.msra.mxu2 %v228_v61  ;;  %353 = vmatpush.msra.mxu1 %v259_v0  ;;  %v216_v30 = vld [vmem:[#allocation5 + $0x1a8] sm:$0xff]  ;;  %v698_v32 = vld [vmem:[#allocation2 + $0x1] ss:$4 sm:$0x3]  ;;  %v213_v34 = vld [vmem:[#allocation5 + $0x190] sm:$0xff] }
  0x2d   :  { %425 = vmatpush.msrb.mxu0 %v193_v62  ;;  %393 = vmatpush.msra.mxu3 %v260_v1  ;;  %v696_v31 = vld [vmem:[#allocation2 + $0x28] ss:$4 sm:$0x3]  ;;  %v179_v33 = vld [vmem:[#allocation5 + $0x80] sm:$0xff]  ;;  %v83_v38 = vmax.f32 %v686_v20, %v698_v32  ;;  %v214_v40 = vld [vmem:[#allocation5 + $0x198] sm:$0xff] }
  0x2e   :  { %465 = vmatpush.msrb.mxu2 %v194_v63  ;;  %445 = vmatpush.msrb.mxu1 %v225_v3  ;;  %v700_v35 = vld [vmem:[#allocation2 + $0x30] ss:$4 sm:$0x3]  ;;  %v702_v36 = vld [vmem:[#allocation2 + $0x9] ss:$4 sm:$0x3] }
  0x2f   :  { %426 = vmatpush.msrb.mxu0 %v191_v2  ;;  %485 = vmatpush.msrb.mxu3 %v226_v5  ;;  %v704_v37 = vld [vmem:[#allocation2 + $0x11] ss:$4 sm:$0x3]  ;;  %v180_v39 = vld [vmem:[#allocation5 + $0x88] sm:$0xff]  ;;  %v84_v44 = vmax.f32 %v688_v23, %v702_v36  ;;  %v211_v47 = vld [vmem:[#allocation5 + $0x180] sm:$0xff] }
  0x30   :  { %466 = vmatpush.msrb.mxu2 %v192_v4  ;;  %446 = vmatpush.msrb.mxu1 %v223_v7  ;;  %v708_v41 = vld [vmem:[#allocation2 + $0x38] ss:$4 sm:$0x3]  ;;  %v710_v42 = vld [vmem:[#allocation2 + $0x19] ss:$4 sm:$0x3]  ;;  %v85_v45 = vmax.f32 %v690_v24, %v704_v37 }
  0x31   :  { %427 = vmatpush.msrb.mxu0 %v189_v6  ;;  %486 = vmatpush.msrb.mxu3 %v224_v9  ;;  %v712_v43 = vld [vmem:[#allocation2 + $0x21] ss:$4 sm:$0x3]  ;;  %v177_v46 = vld [vmem:[#allocation5 + $0x70] sm:$0xff]  ;;  %v86_v50 = vmax.f32 %v692_v27, %v710_v42  ;;  %v178_v51 = vld [vmem:[#allocation5 + $0x78] sm:$0xff] }
  0x32   :  { %467 = vmatpush.msrb.mxu2 %v190_v8  ;;  %447 = vmatpush.msrb.mxu1 %v221_v11  ;;  %v718_v48 = vld [vmem:[#allocation2 + $0x29] ss:$4 sm:$0x3]  ;;  %v720_v49 = vld [vmem:[#allocation2 + $0x31] ss:$4 sm:$0x3]  ;;  %v87_v54 = vmax.f32 %v694_v28, %v712_v43 }
  0x33   :  { %428 = vmatpush.msrb.mxu0 %v187_v10  ;;  %487 = vmatpush.msrb.mxu3 %v222_v13  ;;  %v212_v52 = vld [vmem:[#allocation5 + $0x188] sm:$0xff]  ;;  %v724_v53 = vld [vmem:[#allocation2 + $0x39] ss:$4 sm:$0x3]  ;;  %v175_v56 = vld [vmem:[#allocation5 + $0x60] sm:$0xff]  ;;  %v88_v58 = vmax.f32 %v696_v31, %v718_v48  ;;  %v89_v0 = vmax.f32 %v700_v35, %v720_v49 }
  0x34   :  { %468 = vmatpush.msrb.mxu2 %v188_v12  ;;  %448 = vmatpush.msrb.mxu1 %v219_v15  ;;  %v728_v55 = vld [vmem:[#allocation2 + $0x2] ss:$4 sm:$0x3]  ;;  %v209_v57 = vld [vmem:[#allocation5 + $0x170] sm:$0xff]  ;;  %v176_v62 = vld [vmem:[#allocation5 + $0x68] sm:$0xff]  ;;  %v90_v7 = vmax.f32 %v708_v41, %v724_v53 }
  0x35   :  { %429 = vmatpush.msrb.mxu0 %v185_v14  ;;  %488 = vmatpush.msrb.mxu3 %v220_v17  ;;  %v732_v59 = vld [vmem:[#allocation2 + $0xa] ss:$4 sm:$0x3]  ;;  %v734_v60 = vld [vmem:[#allocation2 + $0x12] ss:$4 sm:$0x3]  ;;  %v115_v61 = vmax.f32 %v83_v38, %v728_v55 }
  0x36   :  { %469 = vmatpush.msrb.mxu2 %v186_v16  ;;  %449 = vmatpush.msrb.mxu1 %v217_v19  ;;  %v210_v63 = vld [vmem:[#allocation5 + $0x178] sm:$0xff]  ;;  %v741_v2 = vld [vmem:[#allocation2 + $0x22] ss:$4 sm:$0x3]  ;;  %v116_v3 = vmax.f32 %v84_v44, %v732_v59  ;;  %v117_v4 = vmax.f32 %v85_v45, %v734_v60  ;;  %v173_v5 = vld [vmem:[#allocation5 + $0x50] sm:$0xff]  ;;  %v75_v45 = vadd.f32 %v698_v32, %v686_v20 }
  0x37   :  { %430 = vmatpush.msrb.mxu0 %v183_v18  ;;  %489 = vmatpush.msrb.mxu3 %v218_v22  ;;  %v739_v1 = vld [vmem:[#allocation2 + $0x1a] ss:$4 sm:$0x3]  ;;  %v207_v6 = vld [vmem:[#allocation5 + $0x160] sm:$0xff]  ;;  %v208_v12 = vld [vmem:[#allocation5 + $0x168] sm:$0xff]  ;;  %v119_v14 = vmax.f32 %v87_v54, %v741_v2  ;;  %v77_v20 = vadd.f32 %v704_v37, %v690_v24  ;;  %v79_v24 = vadd.f32 %v712_v43, %v694_v28 }
  0x38   :  { %470 = vmatpush.msrb.mxu2 %v184_v21  ;;  %450 = vmatpush.msrb.mxu1 %v215_v26  ;;  %v747_v8 = vld [vmem:[#allocation2 + $0x2a] ss:$4 sm:$0x3]  ;;  %v749_v9 = vld [vmem:[#allocation2 + $0x32] ss:$4 sm:$0x3]  ;;  %v118_v10 = vmax.f32 %v86_v50, %v739_v1  ;;  %v107_v37 = vadd.f32 %v728_v55, %v75_v45  ;;  %v81_v28 = vadd.f32 %v720_v49, %v700_v35 }
  0x39   :  { %431 = vmatpush.msrb.mxu0 %v181_v25  ;;  %490 = vmatpush.msrb.mxu3 %v216_v30  ;;  %v174_v11 = vld [vmem:[#allocation5 + $0x58] sm:$0xff]  ;;  %v755_v15 = vld [vmem:[#allocation2 + $0x3] ss:$4 sm:$0x3]  ;;  %v205_v17 = vld [vmem:[#allocation5 + $0x150] sm:$0xff]  ;;  %v120_v18 = vmax.f32 %v88_v58, %v747_v8  ;;  %v121_v26 = vmax.f32 %v89_v0, %v749_v9  ;;  %v109_v43 = vadd.f32 %v734_v60, %v77_v20 }
  0x3a   :  { %471 = vmatpush.msrb.mxu2 %v182_v29  ;;  %451 = vmatpush.msrb.mxu1 %v213_v34  ;;  %v752_v13 = vld [vmem:[#allocation2 + $0x3a] ss:$4 sm:$0x3]  ;;  %v171_v16 = vld [vmem:[#allocation5 + $0x40] sm:$0xff]  ;;  %v147_v22 = vmax.f32 %v115_v61, %v755_v15  ;;  %v172_v25 = vld [vmem:[#allocation5 + $0x48] sm:$0xff]  ;;  %v139_v35 = vadd.f32 %v755_v15, %v107_v37 }
  0x3b   :  { %432 = vmatpush.msrb.mxu0 %v179_v33  ;;  %491 = vmatpush.msrb.mxu3 %v214_v40  ;;  %v758_v19 = vld [vmem:[#allocation2 + $0xb] ss:$4 sm:$0x3]  ;;  %v760_v21 = vld [vmem:[#allocation2 + $0x13] ss:$4 sm:$0x3]  ;;  %v122_v38 = vmax.f32 %v90_v7, %v752_v13  ;;  %v111_v7 = vadd.f32 %v741_v2, %v79_v24 }
  0x3c   :  { %472 = vmatpush.msrb.mxu2 %v180_v39  ;;  %452 = vmatpush.msrb.mxu1 %v211_v47  ;;  %v764_v29 = vld [vmem:[#allocation2 + $0x1b] ss:$4 sm:$0x3]  ;;  %v766_v30 = vld [vmem:[#allocation2 + $0x23] ss:$4 sm:$0x3]  ;;  %v148_v33 = vmax.f32 %v116_v3, %v758_v19  ;;  %v149_v34 = vmax.f32 %v117_v4, %v760_v21 }
  0x3d   :  { %433 = vmatpush.msrb.mxu0 %v177_v46  ;;  %492 = vmatpush.msrb.mxu3 %v212_v52  ;;  %v771_v39 = vld [vmem:[#allocation2 + $0x2b] ss:$4 sm:$0x3]  ;;  %v773_v40 = vld [vmem:[#allocation2 + $0x33] ss:$4 sm:$0x3]  ;;  %v150_v44 = vmax.f32 %v118_v10, %v764_v29  ;;  %v151_v50 = vmax.f32 %v119_v14, %v766_v30 }
  0x3e   :  { %473 = vmatpush.msrb.mxu2 %v178_v51  ;;  %453 = vmatpush.msrb.mxu1 %v209_v57  ;;  %v206_v46 = vld [vmem:[#allocation5 + $0x158] sm:$0xff]  ;;  %299 = vst [vmem:[#allocation1] ss:$9 sm:$0xff] %v147_v22  ;;  %v76_v51 = vadd.f32 %v702_v36, %v688_v23  ;;  %v152_v52 = vmax.f32 %v120_v18, %v771_v39  ;;  %v169_v54 = vld [vmem:[#allocation5 + $0x30] sm:$0xff]  ;;  %v204_v58 = vld [vmem:[#allocation5 + $0x148] sm:$0xff]  ;;  %v155_v15 = vmul.f32 0.25, %v139_v35 }
  0x3f   :  { %434 = vmatpush.msrb.mxu0 %v175_v56  ;;  %493 = vmatpush.msrb.mxu3 %v210_v63  ;;  %v778_v47 = vld [vmem:[#allocation2 + $0x3b] ss:$4 sm:$0x3]  ;;  %301 = vst [vmem:[#allocation1 + $0x1] ss:$9 sm:$0xff] %v148_v33  ;;  %v203_v56 = vld [vmem:[#allocation5 + $0x140] sm:$0xff]  ;;  %v153_v32 = vmax.f32 %v121_v26, %v773_v40  ;;  %v78_v23 = vadd.f32 %v710_v42, %v692_v27 }
  0x40   :  { %474 = vmatpush.msrb.mxu2 %v176_v62  ;;  %454 = vmatpush.msrb.mxu1 %v207_v6  ;;  %303 = vst [vmem:[#allocation1 + $0x2] ss:$9 sm:$0xff] %v149_v34  ;;  %v170_v57 = vld [vmem:[#allocation5 + $0x38] sm:$0xff]  ;;  %v154_v36 = vmax.f32 %v122_v38, %v778_v47  ;;  %v167_v61 = vld [vmem:[#allocation5 + $0x20] sm:$0xff]  ;;  %v201_v62 = vld [vmem:[#allocation5 + $0x130] sm:$0xff]  ;;  %v80_v27 = vadd.f32 %v718_v48, %v696_v31 }
  0x41   :  { %435 = vmatpush.msrb.mxu0 %v173_v5  ;;  %494 = vmatpush.msrb.mxu3 %v208_v12  ;;  %305 = vst [vmem:[#allocation1 + $0x3] ss:$9 sm:$0xff] %v150_v44  ;;  %v168_v63 = vld [vmem:[#allocation5 + $0x28] sm:$0xff]  ;;  %v202_v0 = vld [vmem:[#allocation5 + $0x138] sm:$0xff]  ;;  %v108_v42 = vadd.f32 %v732_v59, %v76_v51  ;;  %v165_v3 = vld [vmem:[#allocation5 + $0x10] sm:$0xff]  ;;  %v82_v31 = vadd.f32 %v724_v53, %v708_v41 }
  0x42   :  { %475 = vmatpush.msrb.mxu2 %v174_v11  ;;  %455 = vmatpush.msrb.mxu1 %v205_v17  ;;  %307 = vst [vmem:[#allocation1 + $0x4] ss:$9 sm:$0xff] %v151_v50  ;;  %v199_v4 = vld [vmem:[#allocation5 + $0x120] sm:$0xff]  ;;  %v166_v55 = vld [vmem:[#allocation5 + $0x18] sm:$0xff]  ;;  %v200_v5 = vld [vmem:[#allocation5 + $0x128] sm:$0xff]  ;;  %v110_v48 = vadd.f32 %v739_v1, %v78_v23  ;;  %v112_v10 = vadd.f32 %v747_v8, %v80_v27 }
  0x43   :  { %436 = vmatpush.msrb.mxu0 %v171_v16  ;;  %495 = vmatpush.msrb.mxu3 %v206_v46  ;;  %309 = vst [vmem:[#allocation1 + $0x5] ss:$9 sm:$0xff] %v152_v52  ;;  %v163_v59 = vld [vmem:[#allocation5] sm:$0xff]  ;;  %v197_v6 = vld [vmem:[#allocation5 + $0x110] sm:$0xff]  ;;  %v164_v49 = vld [vmem:[#allocation5 + $0x8] sm:$0xff]  ;;  %v140_v11 = vadd.f32 %v758_v19, %v108_v42  ;;  %v113_v41 = vadd.f32 %v749_v9, %v81_v28 }
  0x44   :  { %476 = vmatpush.msrb.mxu2 %v172_v25  ;;  %456 = vmatpush.msrb.mxu1 %v203_v56  ;;  %311 = vst [vmem:[#allocation1 + $0x6] ss:$9 sm:$0xff] %v153_v32  ;;  %v198_v60 = vld [vmem:[#allocation5 + $0x118] sm:$0xff]  ;;  %v141_v53 = vadd.f32 %v760_v21, %v109_v43  ;;  %v195_v1 = vld [vmem:[#allocation5 + $0x100] sm:$0xff]  ;;  %v114_v2 = vadd.f32 %v752_v13, %v82_v31  ;;  %v196_v14 = vld [vmem:[#allocation5 + $0x108] sm:$0xff] }
  0x45   :  { %437 = vmatpush.msrb.mxu0 %v169_v54  ;;  %496 = vmatpush.msrb.mxu3 %v204_v58  ;;  %313 = vst [vmem:[#allocation1 + $0x7] ss:$9 sm:$0xff] %v154_v36  ;;  %v142_v12 = vadd.f32 %v764_v29, %v110_v48  ;;  %v143_v8 = vadd.f32 %v766_v30, %v111_v7  ;;  %v156_v17 = vmul.f32 0.25, %v140_v11 }
  0x46   :  { %477 = vmatpush.msrb.mxu2 %v170_v57  ;;  %457 = vmatpush.msrb.mxu1 %v201_v62  ;;  %v144_v16 = vadd.f32 %v771_v39, %v112_v10  ;;  %v145_v9 = vadd.f32 %v773_v40, %v113_v41  ;;  %v157_v18 = vmul.f32 0.25, %v141_v53  ;;  %v146_v13 = vadd.f32 %v778_v47, %v114_v2 }
  0x47   :  { %438 = vmatpush.msrb.mxu0 %v167_v61  ;;  %497 = vmatpush.msrb.mxu3 %v202_v0  ;;  %v158_v22 = vmul.f32 0.25, %v142_v12  ;;  %v159_v25 = vmul.f32 0.25, %v143_v8 }
  0x48   :  { %478 = vmatpush.msrb.mxu2 %v168_v63  ;;  %458 = vmatpush.msrb.mxu1 %v199_v4  ;;  %v160_v26 = vmul.f32 0.25, %v144_v16  ;;  %v161_v29 = vmul.f32 0.25, %v145_v9  ;;  %v162_v30 = vmul.f32 0.25, %v146_v13 }
  0x49   :  { %439 = vmatpush.msrb.mxu0 %v165_v3  ;;  %498 = vmatpush.msrb.mxu3 %v200_v5 }
  0x4a   :  { %479 = vmatpush.msrb.mxu2 %v166_v55  ;;  %459 = vmatpush.msrb.mxu1 %v197_v6 }
  0x4b   :  { %440 = vmatpush.msrb.mxu0 %v163_v59  ;;  %499 = vmatpush.msrb.mxu3 %v198_v60 }
  0x4c   :  { %480 = vmatpush.msrb.mxu2 %v164_v49  ;;  %460 = vmatpush.msrb.mxu1 %v195_v1  ;;  %v314_v19 = vld [vmem:[#allocation1] sm:$0xff]  ;;  %v315_v21 = vld [vmem:[#allocation1 + $0x9] sm:$0xff] }
  0x4d   :  { %500 = vmatpush.msrb.mxu3 %v196_v14  ;;  %334 = vmatmul.f32.vlgmr.msra.gmra.mxu0 %v314_v19  ;;  %406 = vst [vmem:[#allocation1] ss:$9 sm:$0xff] %v155_v15 }
  0x4e   :  { %374 = vmatmul.f32.vlgmr.msra.gmra.mxu2 %v314_v19  ;;  %394 = vmatmul.f32.vlgmr.msra.gmra.mxu3 %v315_v21  ;;  %408 = vst [vmem:[#allocation1 + $0x1] ss:$9 sm:$0xff] %v156_v17 }
  0x4f   :  { %354 = vmatmul.f32.vlgmr.msra.gmra.mxu1 %v315_v21  ;;  %410 = vst [vmem:[#allocation1 + $0x2] ss:$9 sm:$0xff] %v157_v18 }
  0x50   :  { %412 = vst [vmem:[#allocation1 + $0x3] ss:$9 sm:$0xff] %v158_v22 }
  0x51   :  { %414 = vst [vmem:[#allocation1 + $0x4] ss:$9 sm:$0xff] %v159_v25 }
  0x52   :  { %416 = vst [vmem:[#allocation1 + $0x5] ss:$9 sm:$0xff] %v160_v26 }
  0x53   :  { %418 = vst [vmem:[#allocation1 + $0x6] ss:$9 sm:$0xff] %v161_v29 }
  0x54   :  { %420 = vst [vmem:[#allocation1 + $0x7] ss:$9 sm:$0xff] %v162_v30 }
  0x5b   :  { %v421_v33 = vld [vmem:[#allocation1] sm:$0xff]  ;;  %v422_v34 = vld [vmem:[#allocation1 + $0x9] sm:$0xff] }
  0x5c   :  { %441 = vmatmul.f32.vlgmr.msrb.gmra.mxu0 %v421_v33  ;;  %481 = vmatmul.f32.vlgmr.msrb.gmra.mxu2 %v421_v33 }
  0x5d   :  { %461 = vmatmul.f32.vlgmr.msrb.gmra.mxu1 %v422_v34  ;;  %501 = vmatmul.f32.vlgmr.msrb.gmra.mxu3 %v422_v34 }
  0xca   :  { %v335_v38 = vpop.f32.mrf.mxu0 }
  0xcc   :  { %v355_v39 = vpop.f32.mrf.mxu1 }
  0xcd   :  { %v356_v44 = vadd.f32 %v355_v39, %v335_v38 }
  0xd1   :  { %v375_v40 = vpop.f32.mrf.mxu2  ;;  %v395_v45 = vpop.f32.mrf.mxu3 }
  0xd2   :  { %v396_v52 = vadd.f32 %v395_v45, %v375_v40 }
  0xd9   :  { %v442_v46 = vpop.f32.mrf.mxu0 }
  0xda   :  { %v443_v47 = vadd.f32 %v442_v46, %v356_v44  ;;  %v462_v50 = vpop.f32.mrf.mxu1 }
  0xdc   :  { %v463_v51 = vadd.f32 %v462_v50, %v443_v47 }
  0xde   :  { %v563_v54 = vmul.f32 -1.442695, %v463_v51 }
  0xdf   :  { %v482_v56 = vpop.f32.mrf.mxu2 }
  0xe0   :  { %572 = vpow2.f32 %v563_v54  ;;  %v483_v20 = vadd.f32 %v482_v56, %v396_v52  ;;  %v502_v32 = vpop.f32.mrf.mxu3 }
  0xe2   :  { %v503_v57 = vadd.f32 %v502_v32, %v483_v20 }
  0xe4   :  { %v564_v58 = vmul.f32 -1.442695, %v503_v57 }
  0xe6   :  { %v573_v23 = vpop.eup %572  ;;  %574 = vpow2.f32 %v564_v58 }
  0xe7   :  { %v511_v36 = vadd.f32 1.0, %v573_v23 }
  0xe9   :  { %576 = vrcp.f32 %v511_v36  ;;  %v524_v0 = vand.u32 2147483648, %v511_v36  ;;  %v522_v42 = vand.u32 2147483647, %v511_v36  ;;  %vm518_vm1 = vweird.f32 %v511_v36 }
  0xeb   :  { %v525_v43 = vor.u32 1.1754944e-38, %v524_v0  ;;  %vm523_vm3 = vcmp.eq.f32.partialorder %v522_v42, 8.507059e+37 }
  0xec   :  { %v575_v61 = vpop.eup %574 }
  0xed   :  { %v512_v62 = vadd.f32 1.0, %v575_v61 }
  0xef   :  { %v577_v24 = vpop.eup %576  ;;  %578 = vrcp.f32 %v512_v62  ;;  %v539_v48 = vand.u32 2147483648, %v512_v62  ;;  %v537_v6 = vand.u32 2147483647, %v512_v62  ;;  %vm533_vm5 = vweird.f32 %v512_v62 }
  0xf0   :  { %v514_v37 = vmul.f32 %v577_v24, %v511_v36  ;;  %vm519_vm0 = vweird.f32 %v577_v24 }
  0xf1   :  { %vm520_vm2 = vmor %vm518_vm1, %vm519_vm0  ;;  %v540_v35 = vor.u32 1.1754944e-38, %v539_v48  ;;  %vm538_vm7 = vcmp.eq.f32.partialorder %v537_v6, 8.507059e+37 }
  0xf2   :  { %v515_v63 = vsub.f32 1.0, %v514_v37 }
  0xf4   :  { %v516_v27 = vmul.f32 %v577_v24, %v515_v63 }
  0xf5   :  { %v579_v3 = vpop.eup %578 }
  0xf6   :  { %v529_v4 = vmul.f32 %v579_v3, %v512_v62  ;;  %v517_v28 = vadd.f32 %v577_v24, %v516_v27  ;;  %vm534_vm4 = vweird.f32 %v579_v3 }
  0xf7   :  { %vm535_vm6 = vmor %vm533_vm5, %vm534_vm4 }
  0xf8   :  { %v530_v55 = vsub.f32 1.0, %v529_v4  ;;  %v521_v5 = vsel %vm520_vm2, %v577_v24, %v517_v28 }
  0xf9   :  { %v526_v31 = vsel %vm523_vm3, %v525_v43, %v521_v5 }
  0xfa   :  { %v531_v59 = vmul.f32 %v579_v3, %v530_v55  ;;  %543 = vst [vmem:[#allocation7] sm:$0xff] %v526_v31 }
  0xfc   :  { %v532_v7 = vadd.f32 %v579_v3, %v531_v59 }
  0xfe   :  { %v536_v49 = vsel %vm535_vm6, %v579_v3, %v532_v7 }
  0xff   :  { %v541_v60 = vsel %vm538_vm7, %v540_v35, %v536_v49 }
 0x100   :  { %544 = vst [vmem:[#allocation7 + $0x8] sm:$0xff] %v541_v60 }
 0x101   :  { %555 = dma.vmem_to_hbm [thread:$0]  %s551_s1, 256, %s553_s25, [#allocation4]  }
 0x102   :  { %656 = dma.done.wait [#allocation4], 256  }
 0x103   :  { %657 = vsyncadd [#allocation4], 4294967040 }
 0x104   :  { %560 = vsyncpa [#allocation3], 1 }
 0x105   :  { %561 = vsyncpa [#allocation6], 1 }
 0x106   :  { %562 = vsyncpa [#allocation4], 1 }

</bundles_post_ra>
